<compile_context>
chip_gen: v5e
topology: v5e:2x2
jax: 0.10.0
libtpu: 0.0.40
codegen_flags: <defaults>
</compile_context>

<pallas_src>
import functools

import jax
import jax.numpy as jnp
from jax import lax
from jax.experimental import pallas as pl
from jax.experimental.pallas import tpu as pltpu

LANES = 128
MAX_TM = 8192        # max rows per grid step (4 MiB f32 per input per step)
CHUNK_ROWS = 512     # rows per in-kernel compute chunk (bounds VMEM temporaries)
NUM_SPLITS = 2       # leading "parallel" grid axis (dual TensorCore on v7x)


def _round_up(x: int, m: int) -> int:
    return ((x + m - 1) // m) * m


def _bin_loss_kernel(hard_ref, soft_ref, log_out_ref, hard_out_ref, *,
                     tm, chunk, blocks_per_split, rows_valid, needs_mask):
    c = pl.program_id(0)   # split index ("parallel": one per TC on v7x)
    j = pl.program_id(1)   # streaming step within the split ("arbitrary")

    @pl.when(j == 0)
    def _init():
        log_out_ref[...] = jnp.zeros_like(log_out_ref)
        hard_out_ref[...] = jnp.zeros_like(hard_out_ref)

    # First global row covered by this grid step's block.
    block_row0 = (c * blocks_per_split + j) * tm

    def accum(start):
        # `start` is the row offset of this chunk inside the (tm, 128) block.
        hard = hard_ref[pl.ds(start, chunk), :].astype(jnp.float32)
        soft = soft_ref[pl.ds(start, chunk), :].astype(jnp.float32)

        if needs_mask:
            # Rows past the end of the (rows_valid, 128) array (partial last
            # block / clamped duplicate block) contain garbage. Zeroing `hard`
            # there removes them from both the numerator mask and the
            # denominator sum; garbage soft/log values are killed by the
            # select below. ~3 VPU ops/element on an HBM-bound kernel.
            row = block_row0 + start + lax.broadcasted_iota(
                jnp.int32, (chunk, LANES), 0)
            hard = jnp.where(row < rows_valid, hard, 0.0)

        log_soft = jnp.log(jnp.maximum(soft, 1e-12))
        masked_log = jnp.where(hard == 1.0, log_soft, 0.0)

        # vreg-resident accumulation: leading-dim reduce is pure VPU adds; the
        # resident (1, 8, 128) output slab absorbs one vreg add per quantity.
        log_out_ref[0] += jnp.sum(masked_log.reshape(chunk // 8, 8, LANES), axis=0)
        hard_out_ref[0] += jnp.sum(hard.reshape(chunk // 8, 8, LANES), axis=0)

    n_chunks = tm // chunk
    if n_chunks == 1:
        accum(0)
    else:
        @pl.loop(0, n_chunks)
        def _(t):
            accum(pl.multiple_of(t * chunk, chunk))


def bin_loss(hard_attention: jax.Array, soft_attention: jax.Array) -> jax.Array:
    """Pallas implementation of BinLoss.forward. Returns a scalar f32.

    hard.sum() == 0 yields NaN (-0/0), matching the PyTorch module.
    """
    assert hard_attention.shape == soft_attention.shape
    total = hard_attention.size
    assert total > 0

    hard_flat = hard_attention.reshape(-1)
    soft_flat = soft_attention.reshape(-1)

    rows = pl.cdiv(total, LANES)
    if total % LANES != 0:
        # TODO(synk): copy-free 1-D blocking + flat-index masking would avoid
        # this pad copy; it only matters when ragged shapes are actually large.
        pad = rows * LANES - total
        hard_flat = jnp.pad(hard_flat, (0, pad))   # zero pads: no contribution
        soft_flat = jnp.pad(soft_flat, (0, pad))

    hard2d = hard_flat.reshape(rows, LANES)        # copy-free in the aligned case
    soft2d = soft_flat.reshape(rows, LANES)

    # Minimum sublane multiple per input dtype (f32 -> 8, bf16 -> 16,
    # int8/bool -> 32). CHUNK_ROWS (512) is a multiple of all of them.
    def sub_mult(dt):
        return max(8, 32 // jnp.dtype(dt).itemsize)

    sub = max(sub_mult(hard2d.dtype), sub_mult(soft2d.dtype))

    if rows >= 2 * CHUNK_ROWS:
        # Large input: aim for NUM_SPLITS roughly equal row ranges (dual-TC on
        # v7x), streamed in big multi-chunk blocks.
        tm = min(MAX_TM, _round_up(pl.cdiv(rows, NUM_SPLITS), CHUNK_ROWS))
        chunk = CHUNK_ROWS
    else:
        # Small input: a single block, processed in one chunk.
        tm = _round_up(rows, sub)
        chunk = tm

    total_blocks = pl.cdiv(rows, tm)
    num_splits = min(NUM_SPLITS, total_blocks)
    bps = pl.cdiv(total_blocks, num_splits)        # blocks per split
    needs_mask = (num_splits * bps * tm) != rows

    def in_map(c, j):
        # Clamp so a trailing slot of the last split (total_blocks not a
        # multiple of num_splits) never points a DMA past the array; its rows
        # compute as >= rows_valid and are masked in-kernel.
        return (jnp.minimum(c * bps + j, total_blocks - 1), 0)

    kernel = functools.partial(
        _bin_loss_kernel, tm=tm, chunk=chunk, blocks_per_split=bps,
        rows_valid=rows, needs_mask=needs_mask)

    # Explicit VMEM budget: 2 inputs x 2 pipeline buffers x (tm, 128) tile,
    # plus headroom for the chunk-sized temporaries and output slabs.
    # <= ~32 MiB for the largest f32 tile -- inside every generation's
    # physical VMEM (v7x: 64 MiB) without relying on scoped defaults.
    in_buf_bytes = 2 * tm * LANES * (hard2d.dtype.itemsize + soft2d.dtype.itemsize)
    vmem_limit = max(32 * 1024 * 1024, in_buf_bytes + 8 * 1024 * 1024)

    log_part, hard_part = pl.pallas_call(
        kernel,
        out_shape=(
            jax.ShapeDtypeStruct((num_splits, 8, LANES), jnp.float32),
            jax.ShapeDtypeStruct((num_splits, 8, LANES), jnp.float32),
        ),
        grid_spec=pltpu.PrefetchScalarGridSpec(
            num_scalar_prefetch=0,
            grid=(num_splits, bps),
            in_specs=[
                pl.BlockSpec((tm, LANES), in_map),
                pl.BlockSpec((tm, LANES), in_map),
                # NOTE: pipeline_mode=pl.Buffered(3) is a possible small win
                # after the tile-size bump; sweep before adopting.
            ],
            out_specs=[
                pl.BlockSpec((1, 8, LANES), lambda c, j: (c, 0, 0)),
                pl.BlockSpec((1, 8, LANES), lambda c, j: (c, 0, 0)),
            ],
        ),
        compiler_params=pltpu.CompilerParams(
            # Splits are independent (per-split partial slabs) -> "parallel"
            # (sharded across both TCs on v7x, sequential & harmless on
            # v5e/v6e); the streaming axis carries the resident output
            # accumulator -> "arbitrary".
            dimension_semantics=("parallel", "arbitrary"),
            vmem_limit_bytes=int(vmem_limit),
        ),
    )(hard2d, soft2d)

    # Tiny cross-split / cross-slab combine in plain XLA, then the divide.
    return -jnp.sum(log_part) / jnp.sum(hard_part)


def _bin_loss_ref(hard, soft):
    hard = hard.astype(jnp.float32)
    soft = soft.astype(jnp.float32)
    masked_log = jnp.where(hard == 1.0, jnp.log(jnp.maximum(soft, 1e-12)), 0.0)
    return -jnp.sum(masked_log) / jnp.sum(hard)


if __name__ == "__main__":
    key = jax.random.PRNGKey(0)

    # (shape, hard dtype, soft dtype) -- small attention-map-like cases that
    # cover every code path:
    cases = [
        ((2, 4, 16, 16), jnp.float32, jnp.float32),    # aligned, single block
        ((2, 4, 20, 16), jnp.float32, jnp.float32),    # partial block -> row mask
        ((2, 3, 7, 11), jnp.float32, jnp.float32),     # ragged total -> pad fallback
        ((2, 4, 16, 16), jnp.int8, jnp.bfloat16),      # narrow dtypes (fewer HBM bytes)
        ((2, 4, 256, 128), jnp.float32, jnp.float32),  # 2-way split + chunk loop
        ((2, 4, 200, 128), jnp.float32, jnp.float32),  # split + chunk loop + mask
    ]
    for shape, hdt, sdt in cases:
        key, k_hard, k_soft = jax.random.split(key, 3)
        hard = jax.random.bernoulli(k_hard, p=0.3, shape=shape).astype(hdt)
        soft = jax.random.uniform(
            k_soft, shape=shape, dtype=jnp.float32, minval=1e-6, maxval=1.0
        ).astype(sdt)

        loss = bin_loss(hard, soft)
        jax.block_until_ready(loss)

        ref = _bin_loss_ref(hard, soft)
        assert jnp.allclose(loss, ref, rtol=1e-5, atol=1e-5), (shape, loss, ref)

    print("KERNEL_OK")
</pallas_src>

<mosaic_0001>
module attributes {stable_mosaic.version = 11 : i64} {
  func.func @_bin_loss_kernel(%arg0: i32, %arg1: i32, %arg2: memref<16x128xf32, #tpu.memory_space<vmem>>, %arg3: memref<16x128xf32, #tpu.memory_space<vmem>>, %arg4: memref<1x8x128xf32, #tpu.memory_space<vmem>>, %arg5: memref<1x8x128xf32, #tpu.memory_space<vmem>>) attributes {dimension_semantics = [#tpu.dimension_semantics<parallel>, #tpu.dimension_semantics<arbitrary>], iteration_bounds = array<i64: 1, 1>, scalar_prefetch = 0 : i64, scratch_operands = 0 : i64, tpu.core_type = #tpu.core_type<tc>, window_params = [{transform_indices = @transform_0, window_bounds = array<i64: 16, 128>}, {transform_indices = @transform_1, window_bounds = array<i64: 16, 128>}, {transform_indices = @transform_2, window_bounds = array<i64: 1, 8, 128>}, {transform_indices = @transform_3, window_bounds = array<i64: 1, 8, 128>}]} {
    %c0_i32 = arith.constant 0 : i32
    %0 = arith.cmpi eq, %arg1, %c0_i32 : i32
    %1 = arith.extui %0 : i1 to i32
    %c0_i32_0 = arith.constant 0 : i32
    %2 = arith.cmpi ne, %1, %c0_i32_0 : i32
    scf.if %2 {
      %cst_20 = arith.constant 0.000000e+00 : f32
      %28 = vector.broadcast %cst_20 : f32 to vector<1x8x128xf32>
      %c0_21 = arith.constant 0 : index
      %c0_22 = arith.constant 0 : index
      %c0_23 = arith.constant 0 : index
      %29 = vector.load %arg4[%c0_21, %c0_22, %c0_23] : memref<1x8x128xf32, #tpu.memory_space<vmem>>, vector<1x8x128xf32>
      tpu.vector_store %arg4[%c0_21, %c0_22, %c0_23], %28 {strides = array<i32>} : memref<1x8x128xf32, #tpu.memory_space<vmem>>, vector<1x8x128xf32>,
      %cst_24 = arith.constant 0.000000e+00 : f32
      %30 = vector.broadcast %cst_24 : f32 to vector<1x8x128xf32>
      %c0_25 = arith.constant 0 : index
      %c0_26 = arith.constant 0 : index
      %c0_27 = arith.constant 0 : index
      %31 = vector.load %arg5[%c0_25, %c0_26, %c0_27] : memref<1x8x128xf32, #tpu.memory_space<vmem>>, vector<1x8x128xf32>
      tpu.vector_store %arg5[%c0_25, %c0_26, %c0_27], %30 {strides = array<i32>} : memref<1x8x128xf32, #tpu.memory_space<vmem>>, vector<1x8x128xf32>,
    } else {
    }
    %c0 = arith.constant 0 : index
    %c0_1 = arith.constant 0 : index
    %3 = vector.load %arg2[%c0, %c0_1] : memref<16x128xf32, #tpu.memory_space<vmem>>, vector<16x128xf32>
    %c0_2 = arith.constant 0 : index
    %c0_3 = arith.constant 0 : index
    %4 = vector.load %arg3[%c0_2, %c0_3] : memref<16x128xf32, #tpu.memory_space<vmem>>, vector<16x128xf32>
    %cst = arith.constant 9.99999996E-13 : f32
    %5 = vector.broadcast %cst : f32 to vector<16x128xf32>
    %6 = arith.maximumf %4, %5 : vector<16x128xf32>
    %7 = math.log %6 : vector<16x128xf32>
    %cst_4 = arith.constant 1.000000e+00 : f32
    %8 = vector.broadcast %cst_4 : f32 to vector<16x128xf32>
    %9 = arith.cmpf oeq, %3, %8 : vector<16x128xf32>
    %cst_5 = arith.constant 0.000000e+00 : f32
    %10 = vector.broadcast %cst_5 : f32 to vector<16x128xf32>
    %11 = arith.select %9, %7, %10 : vector<16x128xi1>, vector<16x128xf32>
    %c0_6 = arith.constant 0 : index
    %c0_7 = arith.constant 0 : index
    %c0_8 = arith.constant 0 : index
    %12 = vector.load %arg4[%c0_6, %c0_7, %c0_8] : memref<1x8x128xf32, #tpu.memory_space<vmem>>, vector<1x8x128xf32>
    %13 = vector.shape_cast %12 : vector<1x8x128xf32> to vector<8x128xf32>
    %14 = vector.shape_cast %11 : vector<16x128xf32> to vector<2x8x128xf32>
    %cst_9 = arith.constant dense<0.000000e+00> : vector<8x128xf32>
    %15 = vector.multi_reduction <add>, %14, %cst_9 [0] : vector<2x8x128xf32> to vector<8x128xf32>
    %16 = arith.addf %13, %15 : vector<8x128xf32>
    %c0_10 = arith.constant 0 : index
    %c0_11 = arith.constant 0 : index
    %c0_12 = arith.constant 0 : index
    %17 = vector.load %arg4[%c0_10, %c0_11, %c0_12] : memref<1x8x128xf32, #tpu.memory_space<vmem>>, vector<1x8x128xf32>
    %18 = vector.shape_cast %17 : vector<1x8x128xf32> to vector<8x128xf32>
    %19 = vector.shape_cast %16 : vector<8x128xf32> to vector<1x8x128xf32>
    tpu.vector_store %arg4[%c0_10, %c0_11, %c0_12], %19 {strides = array<i32>} : memref<1x8x128xf32, #tpu.memory_space<vmem>>, vector<1x8x128xf32>,
    %c0_13 = arith.constant 0 : index
    %c0_14 = arith.constant 0 : index
    %c0_15 = arith.constant 0 : index
    %20 = vector.load %arg5[%c0_13, %c0_14, %c0_15] : memref<1x8x128xf32, #tpu.memory_space<vmem>>, vector<1x8x128xf32>
    %21 = vector.shape_cast %20 : vector<1x8x128xf32> to vector<8x128xf32>
    %22 = vector.shape_cast %3 : vector<16x128xf32> to vector<2x8x128xf32>
    %cst_16 = arith.constant dense<0.000000e+00> : vector<8x128xf32>
    %23 = vector.multi_reduction <add>, %22, %cst_16 [0] : vector<2x8x128xf32> to vector<8x128xf32>
    %24 = arith.addf %21, %23 : vector<8x128xf32>
    %c0_17 = arith.constant 0 : index
    %c0_18 = arith.constant 0 : index
    %c0_19 = arith.constant 0 : index
    %25 = vector.load %arg5[%c0_17, %c0_18, %c0_19] : memref<1x8x128xf32, #tpu.memory_space<vmem>>, vector<1x8x128xf32>
    %26 = vector.shape_cast %25 : vector<1x8x128xf32> to vector<8x128xf32>
    %27 = vector.shape_cast %24 : vector<8x128xf32> to vector<1x8x128xf32>
    tpu.vector_store %arg5[%c0_17, %c0_18, %c0_19], %27 {strides = array<i32>} : memref<1x8x128xf32, #tpu.memory_space<vmem>>, vector<1x8x128xf32>,
    return
  }
  func.func @transform_0(%arg0: i32, %arg1: i32) -> (i32, i32) {
    %c1_i32 = arith.constant 1 : i32
    %0 = arith.muli %arg0, %c1_i32 : i32
    %1 = arith.addi %0, %arg1 : i32
    %c0_i32 = arith.constant 0 : i32
    %2 = arith.minsi %1, %c0_i32 : i32
    %c0_i32_0 = arith.constant 0 : i32
    %c0_i32_1 = arith.constant 0 : i32
    return %2, %c0_i32_0 : i32, i32
  }
  func.func @transform_1(%arg0: i32, %arg1: i32) -> (i32, i32) {
    %c1_i32 = arith.constant 1 : i32
    %0 = arith.muli %arg0, %c1_i32 : i32
    %1 = arith.addi %0, %arg1 : i32
    %c0_i32 = arith.constant 0 : i32
    %2 = arith.minsi %1, %c0_i32 : i32
    %c0_i32_0 = arith.constant 0 : i32
    %c0_i32_1 = arith.constant 0 : i32
    return %2, %c0_i32_0 : i32, i32
  }
  func.func @transform_2(%arg0: i32, %arg1: i32) -> (i32, i32, i32) {
    %c0_i32 = arith.constant 0 : i32
    %c0_i32_0 = arith.constant 0 : i32
    %c0_i32_1 = arith.constant 0 : i32
    return %arg0, %c0_i32, %c0_i32_0 : i32, i32, i32
  }
  func.func @transform_3(%arg0: i32, %arg1: i32) -> (i32, i32, i32) {
    %c0_i32 = arith.constant 0 : i32
    %c0_i32_0 = arith.constant 0 : i32
    %c0_i32_1 = arith.constant 0 : i32
    return %arg0, %c0_i32, %c0_i32_0 : i32, i32, i32
  }
}

</mosaic_0001>

<bundles_post_ra>
// kernel: tpu_custom_call.1
= control target key start
LH: loop header
LB: loop body
LE: loop exit
PB: predicated region body
PF: predicated region fallthrough
CT: control target
= control target key end

     0   :  { %9 = vsyncpa [#allocation3], 0  ;;  %s286_s0 = inlined_call_operand.hbm [shape: f32[16,128], index: 0, kind: input, shape index: {}]   ;;  %s287_s1 = inlined_call_operand.hbm [shape: f32[16,128], index: 1, kind: input, shape index: {}]   ;;  %s288_s2 = inlined_call_operand.hbm [shape: f32[1,8,128], index: 2, kind: output, shape index: {0}]   ;;  %s289_s3 = inlined_call_operand.hbm [shape: f32[1,8,128], index: 3, kind: output, shape index: {1}]  }
   0x1   :  { %10 = vsyncpa [#allocation6], 0 }
   0x2   :  { %11 = vsyncpa [#allocation4], 0 }
   0x3   :  { %12 = vsyncpa [#allocation9], 0  ;;  %s23_s14 = sshll.u32 %s286_s0, 4  ;;  %s248_s15 = smov [#allocation2]   ;;  %s24_s14 = int_to_ptr.hbm [resolvable:$true] %s23_s14 }
   0x4   :  { %s25_s16 = sshll.u32 %s248_s15, 4  ;;  %s42_s19 = sshll.u32 %s287_s1, 4  ;;  %s26_s16 = int_to_ptr.vmem [resolvable:$true] %s25_s16  ;;  %s43_s19 = int_to_ptr.hbm [resolvable:$true] %s42_s19 }
   0x5   :  { %s249_s20 = smov 128   ;;  %s250_s21 = smov 8  }
   0x6   :  { %31 = dma.hbm_to_vmem [thread:$0]  %s24_s14, 256, %s26_s16, [#allocation3], %s249_s20, %s249_s20, %s250_s21  }
   0x7   :  { %s251_s22 = smov [#allocation5]  }
   0x8   :  { %s44_s23 = sshll.u32 %s251_s22, 4  ;;  %s45_s23 = int_to_ptr.vmem [resolvable:$true] %s44_s23 }
   0x9   :  { %50 = dma.hbm_to_vmem [thread:$0]  %s43_s19, 256, %s45_s23, [#allocation6], %s249_s20, %s249_s20, %s250_s21  }
   0xa   :  { %240 = dma.done.wait [#allocation3], 256  }
   0xb   :  { %241 = vsyncadd [#allocation3], 4294967040 }
   0xc   :  { %242 = dma.done.wait [#allocation6], 256  }
   0xd   :  { %243 = vsyncadd [#allocation6], 4294967040  ;;  %v73_v0 = vld [vmem:[#allocation2] sm:$0xff]  ;;  %v74_v1 = vld [vmem:[#allocation2 + $0x8] sm:$0xff]  ;;  %s252_s0 = smov [#allocation8]   ;;  %s113_s1 = sshll.u32 %s289_s3, 4  ;;  %s114_s1 = int_to_ptr.hbm [resolvable:$true] %s113_s1 }
   0xe   :  { %v75_v2 = vld [vmem:[#allocation5] sm:$0xff]  ;;  %s111_s24 = sshll.u32 %s252_s0, 4  ;;  %v76_v3 = vld [vmem:[#allocation5 + $0x8] sm:$0xff]  ;;  %v92_v5 = vadd.f32 %v74_v1, %v73_v0  ;;  %vm83_vm0 = vcmp.eq.f32.partialorder %v73_v0, 1.0  ;;  %vm84_vm1 = vcmp.eq.f32.partialorder %v74_v1, 1.0  ;;  %s253_s27 = smov [#allocation7]   ;;  %s112_s24 = int_to_ptr.vmem [resolvable:$true] %s111_s24 }
   0xf   :  { %v77_v4 = vmax.f32 %v75_v2, 1e-12  ;;  %v78_v6 = vmax.f32 %v76_v3, 1e-12  ;;  %s100_s3 = sshll.u32 %s253_s27, 4  ;;  %s102_s30 = sshll.u32 %s288_s2, 4  ;;  %s101_s3 = int_to_ptr.vmem [resolvable:$true] %s100_s3  ;;  %s103_s30 = int_to_ptr.hbm [resolvable:$true] %s102_s30 }
  0x10   :  { %94 = vst [vmem:[#allocation8] sm:$0xff] %v92_v5 }
  0x11   :  { %140 = vlog2.f32 %v77_v4  ;;  %116 = dma.vmem_to_hbm [thread:$0]  %s112_s24, 128, %s114_s1, [#allocation9]  }
  0x12   :  { %142 = vlog2.f32 %v78_v6 }
  0x17   :  { %v141_v7 = vpop.eup %140 }
  0x18   :  { %v143_v8 = vpop.eup %142  ;;  %v80_v9 = vmul.f32 0.6931472, %v141_v7 }
  0x19   :  { %v82_v10 = vmul.f32 0.6931472, %v143_v8 }
  0x1a   :  { %v85_v11 = vsel %vm83_vm0, %v80_v9, 0.0 }
  0x1b   :  { %v86_v12 = vsel %vm84_vm1, %v82_v10, 0.0 }
  0x1c   :  { %v88_v13 = vadd.f32 %v86_v12, %v85_v11 }
  0x1e   :  { %90 = vst [vmem:[#allocation7] sm:$0xff] %v88_v13 }
  0x1f   :  { %105 = dma.vmem_to_hbm [thread:$0]  %s101_s3, 128, %s103_s30, [#allocation4]  }
  0x20   :  { %244 = dma.done.wait [#allocation4], 128  }
  0x21   :  { %245 = vsyncadd [#allocation4], 4294967168 }
  0x22   :  { %246 = dma.done.wait [#allocation9], 128  }
  0x23   :  { %247 = vsyncadd [#allocation9], 4294967168 }
  0x24   :  { %125 = vsyncpa [#allocation3], 1 }
  0x25   :  { %126 = vsyncpa [#allocation6], 1 }
  0x26   :  { %127 = vsyncpa [#allocation4], 1 }
  0x27   :  { %128 = vsyncpa [#allocation9], 1 }

</bundles_post_ra>
